<compile_context>
chip_gen: v6e
topology: v6e:2x2x1
jax: 0.10.0
libtpu: 0.0.40
codegen_flags: <defaults>
</compile_context>

<pallas_src>
import functools

import jax
import jax.numpy as jnp
from jax.experimental import pallas as pl
from jax.experimental.pallas import tpu as pltpu


# --------------------------------------------------------------------------
# Shared math: used by BOTH the Pallas kernel body (lowered by Mosaic) and the
# pure-JAX reference (lowered by XLA), so the algorithm is identical.
# --------------------------------------------------------------------------
def _gcn_forward_math(adj, x, ws, *, orders, n_valid, compute_dtype):
    cd = compute_dtype
    adj = adj.astype(cd)
    h = x.astype(cd)
    n_layers = len(ws)
    for idx, (w, adj_first) in enumerate(zip(ws, orders)):
        w = w.astype(cd)
        if adj_first:
            # (adj @ h) @ w   -- cheaper when F_in <= F_out
            t = jnp.dot(adj, h, preferred_element_type=jnp.float32).astype(cd)
            y = jnp.dot(t, w, preferred_element_type=jnp.float32)
        else:
            # adj @ (h @ w)   -- cheaper when F_out < F_in
            t = jnp.dot(h, w, preferred_element_type=jnp.float32).astype(cd)
            y = jnp.dot(adj, t, preferred_element_type=jnp.float32)
        if idx != n_layers - 1:
            # Inter-layer ReLU, fused.  Dropout is identity in eval mode.
            # TODO(synk): training-mode dropout (Bernoulli mask via
            # pltpu.prng_random_bits) not implemented; eval semantics assumed.
            h = jnp.maximum(y, 0.0).astype(cd)
        else:
            h = y  # keep f32 logits for the softmax epilogue

    # Masked log_softmax over the feature axis (columns >= n_valid are the
    # lane-padding introduced for a dense HBM store).
    col = jax.lax.broadcasted_iota(jnp.int32, h.shape, 1)
    valid = col < n_valid
    hm = jnp.where(valid, h, -jnp.inf)
    m = jnp.max(hm, axis=1, keepdims=True)
    e = jnp.exp(hm - m)                 # exp(-inf) == 0 in padded columns
    lse = jnp.log(jnp.sum(e, axis=1, keepdims=True))
    out = hm - m - lse
    return jnp.where(valid, out, 0.0)


# --------------------------------------------------------------------------
# Fused Pallas kernel: all layers + ReLU + masked log_softmax, one invocation.
# --------------------------------------------------------------------------
def _fused_gcn_kernel(*refs, orders, n_valid, compute_dtype):
    adj_ref, x_ref = refs[0], refs[1]
    w_refs = refs[2:-1]
    out_ref = refs[-1]
    out = _gcn_forward_math(
        adj_ref[...],
        x_ref[...],
        [w_ref[...] for w_ref in w_refs],
        orders=orders,
        n_valid=n_valid,
        compute_dtype=compute_dtype,
    )
    out_ref[...] = out.astype(out_ref.dtype)


# --------------------------------------------------------------------------
# Preprocessing shared by the Pallas wrapper and the pure-JAX reference.
# --------------------------------------------------------------------------
def _prepare(adj, x, layer_params, *, compute_dtype, lane_pad):
    adj_c = adj.astype(compute_dtype)
    x_c = x.astype(compute_dtype)

    f_out_logical = layer_params[-1][0].shape[1]
    ws, orders = [], []
    f_in = x.shape[1]
    for idx, (w, _left_to_right) in enumerate(layer_params):
        w_c = w.astype(compute_dtype)
        if idx == len(layer_params) - 1:
            # Lane-dense final store: pad the output feature dim to a multiple
            # of 128.  Zero columns do not change the valid logits.
            pad = (-w_c.shape[1]) % lane_pad
            if pad:
                w_c = jnp.pad(w_c, ((0, 0), (0, pad)))
        f_o = w_c.shape[1]
        # Auto-pick contraction order from the actual operand shapes (the
        # module's left_to_right flag only changes fp association).
        orders.append(bool(f_in <= f_o))
        ws.append(w_c)
        f_in = f_o
    return adj_c, x_c, ws, tuple(orders), f_out_logical, ws[-1].shape[1]


# --------------------------------------------------------------------------
# Model wrappers — mirror simple_PyG_gcn.forward (eval mode).
# --------------------------------------------------------------------------
def simple_pyg_gcn_forward(adj, x, layer_params, *, compute_dtype=jnp.bfloat16,
                           lane_pad=128):
    """layer_params: list of (w, left_to_right) per simple_gcn_layer."""
    adj_c, x_c, ws, orders, f_out, f_out_pad = _prepare(
        adj, x, layer_params, compute_dtype=compute_dtype, lane_pad=lane_pad)
    n = adj_c.shape[0]

    # --- cost / VMEM budgeting -------------------------------------------
    itob = lambda a: a.size * a.dtype.itemsize
    in_bytes = itob(adj_c) + itob(x_c) + sum(itob(w) for w in ws)
    out_bytes = n * f_out_pad * 4
    flops = 0
    tr = n * (f_out_pad + 1)  # exp per logit + log per row
    f_i = x_c.shape[1]
    for w, adj_first in zip(ws, orders):
        f_o = w.shape[1]
        width = f_i if adj_first else f_o
        flops += 2 * n * n * width + 2 * n * f_i * f_o
        f_i = f_o
    inter_bytes = 2 * n * max(w.shape[1] for w in ws) * 4
    vmem_needed = 2 * (in_bytes + out_bytes) + inter_bytes
    assert vmem_needed < 40 * 1024 * 1024, (
        "fused single-invocation path needs the whole graph resident in VMEM;"
        " use a row-tiled multi-call path for larger graphs")
    # <= 48 MiB: leaves headroom for double-buffers / internal scratch on
    # v7x's 64 MiB VMEM per TensorCore.
    vmem_limit = int(min(48 << 20, max(16 << 20, 4 * vmem_needed)))

    kernel = functools.partial(
        _fused_gcn_kernel,
        orders=orders,
        n_valid=f_out,
        compute_dtype=compute_dtype,
    )

    whole = lambda arr: pl.BlockSpec(arr.shape, lambda: (0, 0))
    out_padded = pl.pallas_call(
        kernel,
        out_shape=jax.ShapeDtypeStruct((n, f_out_pad), jnp.float32),
        in_specs=[whole(adj_c), whole(x_c)] + [whole(w) for w in ws],
        out_specs=pl.BlockSpec((n, f_out_pad), lambda: (0, 0)),
        compiler_params=pltpu.CompilerParams(vmem_limit_bytes=vmem_limit),
        cost_estimate=pl.CostEstimate(
            flops=int(flops),
            transcendentals=int(tr),
            bytes_accessed=int(in_bytes + out_bytes),
        ),
    )(adj_c, x_c, *ws)

    # Narrow logical width lives only at the wrapper level.
    return out_padded[:, :f_out]


def simple_pyg_gcn_reference(adj, x, layer_params, *, compute_dtype=jnp.bfloat16,
                             lane_pad=128):
    """Pure-JAX (XLA) reference using the identical algorithm / casts."""
    adj_c, x_c, ws, orders, f_out, _ = _prepare(
        adj, x, layer_params, compute_dtype=compute_dtype, lane_pad=lane_pad)
    out = _gcn_forward_math(adj_c, x_c, ws, orders=orders, n_valid=f_out,
                            compute_dtype=compute_dtype)
    return out[:, :f_out]


if __name__ == "__main__":
    # Small synthetic graph: N nodes, F_in -> hidden -> F_out
    N, F_IN, HIDDEN, F_OUT = 32, 16, 32, 8

    key = jax.random.PRNGKey(0)
    k_x, k_adj, k_w1, k_w2 = jax.random.split(key, 4)

    # Node features
    x = jax.random.normal(k_x, (N, F_IN), dtype=jnp.float32)

    # Symmetric dense adjacency with self-loops (stand-in for adj_t.to_dense())
    a = (jax.random.uniform(k_adj, (N, N)) > 0.8).astype(jnp.float32)
    adj = jnp.clip(a + a.T + jnp.eye(N, dtype=jnp.float32), 0.0, 1.0)

    # Parameter init matching torch.rand([in, out]) ~ U[0,1)
    w1 = jax.random.uniform(k_w1, (F_IN, HIDDEN), dtype=jnp.float32)
    w2 = jax.random.uniform(k_w2, (HIDDEN, F_OUT), dtype=jnp.float32)

    # (weight, left_to_right) — flag kept for API parity; the kernel picks the
    # mathematically-equivalent cheaper contraction order from shapes.
    layer_params = [(w1, True), (w2, False)]

    out = simple_pyg_gcn_forward(adj, x, layer_params)
    out = jax.block_until_ready(out)
    assert out.shape == (N, F_OUT)

    # Validate the Pallas kernel against the same algorithm run through XLA.
    ref = simple_pyg_gcn_reference(adj, x, layer_params)
    max_err = float(jnp.max(jnp.abs(out - ref)))
    assert jnp.allclose(out, ref, atol=1e-2, rtol=1e-2), max_err

    print("KERNEL_OK")
</pallas_src>

<mosaic_0001>
module attributes {stable_mosaic.version = 11 : i64} {
  func.func @_fused_gcn_kernel(%arg0: memref<32x32xbf16, #tpu.memory_space<vmem>>, %arg1: memref<32x16xbf16, #tpu.memory_space<vmem>>, %arg2: memref<16x32xbf16, #tpu.memory_space<vmem>>, %arg3: memref<32x128xbf16, #tpu.memory_space<vmem>>, %arg4: memref<32x128xf32, #tpu.memory_space<vmem>>) attributes {dimension_semantics = [], scalar_prefetch = 0 : i64, scratch_operands = 0 : i64, tpu.core_type = #tpu.core_type<tc>} {
    %c0 = arith.constant 0 : index
    %c0_0 = arith.constant 0 : index
    %0 = vector.load %arg0[%c0, %c0_0] : memref<32x32xbf16, #tpu.memory_space<vmem>>, vector<32x32xbf16>
    %c0_1 = arith.constant 0 : index
    %c0_2 = arith.constant 0 : index
    %1 = vector.load %arg1[%c0_1, %c0_2] : memref<32x16xbf16, #tpu.memory_space<vmem>>, vector<32x16xbf16>
    %c0_3 = arith.constant 0 : index
    %c0_4 = arith.constant 0 : index
    %2 = vector.load %arg2[%c0_3, %c0_4] : memref<16x32xbf16, #tpu.memory_space<vmem>>, vector<16x32xbf16>
    %c0_5 = arith.constant 0 : index
    %c0_6 = arith.constant 0 : index
    %3 = vector.load %arg3[%c0_5, %c0_6] : memref<32x128xbf16, #tpu.memory_space<vmem>>, vector<32x128xbf16>
    %cst = arith.constant dense<0.000000e+00> : vector<32x16xf32>
    %4 = tpu.matmul %0, %1, %cst {dimension_numbers = #tpu.dot_dimension_numbers<[1], [0], [0], [1], [0, 0, 1, 1], [], []>} : vector<32x32xbf16>, vector<32x16xbf16>, vector<32x16xf32> -> vector<32x16xf32>
    %5 = arith.truncf %4 : vector<32x16xf32> to vector<32x16xbf16>
    %cst_7 = arith.constant dense<0.000000e+00> : vector<32x32xf32>
    %6 = tpu.matmul %5, %2, %cst_7 {dimension_numbers = #tpu.dot_dimension_numbers<[1], [0], [0], [1], [0, 0, 1, 1], [], []>} : vector<32x16xbf16>, vector<16x32xbf16>, vector<32x32xf32> -> vector<32x32xf32>
    %cst_8 = arith.constant 0.000000e+00 : f32
    %7 = vector.broadcast %cst_8 : f32 to vector<32x32xf32>
    %8 = arith.maximumf %6, %7 : vector<32x32xf32>
    %9 = arith.truncf %8 : vector<32x32xf32> to vector<32x32xbf16>
    %cst_9 = arith.constant dense<0.000000e+00> : vector<32x32xf32>
    %10 = tpu.matmul %0, %9, %cst_9 {dimension_numbers = #tpu.dot_dimension_numbers<[1], [0], [0], [1], [0, 0, 1, 1], [], []>} : vector<32x32xbf16>, vector<32x32xbf16>, vector<32x32xf32> -> vector<32x32xf32>
    %11 = arith.truncf %10 : vector<32x32xf32> to vector<32x32xbf16>
    %cst_10 = arith.constant dense<0.000000e+00> : vector<32x128xf32>
    %12 = tpu.matmul %11, %3, %cst_10 {dimension_numbers = #tpu.dot_dimension_numbers<[1], [0], [0], [1], [0, 0, 1, 1], [], []>} : vector<32x32xbf16>, vector<32x128xbf16>, vector<32x128xf32> -> vector<32x128xf32>
    %13 = tpu.iota {dimensions = array<i32: 1>} : vector<32x128xi32>
    %c8_i32 = arith.constant 8 : i32
    %14 = vector.broadcast %c8_i32 : i32 to vector<32x128xi32>
    %15 = arith.cmpi slt, %13, %14 : vector<32x128xi32>
    %cst_11 = arith.constant 0xFF800000 : f32
    %16 = vector.broadcast %cst_11 : f32 to vector<32x128xf32>
    %17 = arith.select %15, %12, %16 : vector<32x128xi1>, vector<32x128xf32>
    %cst_12 = arith.constant dense<0xFF800000> : vector<32xf32>
    %18 = vector.multi_reduction <maximumf>, %17, %cst_12 [1] : vector<32x128xf32> to vector<32xf32>
    %19 = vector.shape_cast %18 : vector<32xf32> to vector<32x1xf32>
    %20 = vector.broadcast %19 : vector<32x1xf32> to vector<32x128xf32>
    %21 = arith.subf %17, %20 : vector<32x128xf32>
    %22 = math.exp %21 : vector<32x128xf32>
    %cst_13 = arith.constant dense<0.000000e+00> : vector<32xf32>
    %23 = vector.multi_reduction <add>, %22, %cst_13 [1] : vector<32x128xf32> to vector<32xf32>
    %24 = vector.shape_cast %23 : vector<32xf32> to vector<32x1xf32>
    %25 = math.log %24 : vector<32x1xf32>
    %26 = vector.broadcast %19 : vector<32x1xf32> to vector<32x128xf32>
    %27 = arith.subf %17, %26 : vector<32x128xf32>
    %28 = vector.broadcast %25 : vector<32x1xf32> to vector<32x128xf32>
    %29 = arith.subf %27, %28 : vector<32x128xf32>
    %cst_14 = arith.constant 0.000000e+00 : f32
    %30 = vector.broadcast %cst_14 : f32 to vector<32x128xf32>
    %31 = arith.select %15, %29, %30 : vector<32x128xi1>, vector<32x128xf32>
    %c0_15 = arith.constant 0 : index
    %c0_16 = arith.constant 0 : index
    %32 = vector.load %arg4[%c0_15, %c0_16] : memref<32x128xf32, #tpu.memory_space<vmem>>, vector<32x128xf32>
    tpu.vector_store %arg4[%c0_15, %c0_16], %31 {strides = array<i32>} : memref<32x128xf32, #tpu.memory_space<vmem>>, vector<32x128xf32>,
    return
  }
}

</mosaic_0001>

<bundles_post_ra>
// kernel: tpu_custom_call.1
= control target key start
LH: loop header
LB: loop body
LE: loop exit
PB: predicated region body
PF: predicated region fallthrough
CT: control target
= control target key end

     0   :  { %9 = vsyncpa [#allocation3], 0  ;;  %s595_s0 = inlined_call_operand.vmem [shape: bf16[32,32], index: 0, kind: input, shape index: {}]   ;;  %s596_s1 = inlined_call_operand.vmem [shape: bf16[32,16], index: 1, kind: input, shape index: {}]   ;;  %s597_s2 = inlined_call_operand.vmem [shape: bf16[16,32], index: 2, kind: input, shape index: {}]   ;;  %s598_s3 = inlined_call_operand.hbm [shape: bf16[32,128], index: 3, kind: input, shape index: {}]   ;;  %s599_s4 = inlined_call_operand.hbm [shape: f32[32,128], index: 4, kind: output, shape index: {}]  }
   0x1   :  { %10 = vsyncpa [#allocation4], 0  ;;  %s518_s15 = smov [#allocation2]  }
   0x2   :  { %s22_s16 = sshll.u32 %s518_s15, 4  ;;  %s23_s16 = int_to_ptr.vmem [resolvable:$true] %s22_s16 }
   0x3   :  { %s482_s17 = scalar_lea.vmem %s23_s16, 256  ;;  %p487_p1 = scmp.lt.s32.totalorder %s23_s16, %s23_s16 }
   0x4   :  { %p483_p0 = scmp.ne.s32.totalorder %s23_s16, %s482_s17  ;;  %p488_p2 = scmp.lt.s32.totalorder %s482_s17, %s482_s17 }
   0x6   :  { %p489_p3 = por %p488_p2, %p487_p1 }
   0x8   :  { %p490_p4 = pnand %p489_p3, %p483_p0 }
   0xa   :  { %493 = shalt.err (!%p490_p4)
}
   0xb   :  { %s519_s18 = smov 64   ;;  %s520_s19 = smov 4  }
   0xc   :  { %28 = dma.hbm_to_vmem [thread:$0]  %s598_s3, 256, %s23_s16, [#allocation3], %s519_s18, %s519_s18, %s520_s19  }
   0xd   :  { %514 = dma.done.wait [#allocation3], 256  }
   0xe   :  { %515 = vsyncadd [#allocation3], 4294967040  ;;  %v451_v0 = vld [vmem:[%s596_s1 + $0x8] sm:$0xff]   ;;  %v452_v1 = vld [vmem:[%s596_s1] sm:$0xff]   ;;  %vm69_vm0 = vcmask 261120   ;;  %vm133_vm1 = vcmask 130048   ;;  %v313_v29 = vlaneseq }
   0xf   :  { %415 = vmatprep.subr.bf16.mxu0 %v451_v0  ;;  %v453_v2 = vld [vmem:[%s595_s0] sm:$0xff]   ;;  %v454_v3 = vld [vmem:[%s595_s0 + $0x8] sm:$0xff]   ;;  %s521_s0 = smov [#allocation5]  }
  0x10   :  { %416 = vmatpush3.bf16.msra.mxu0 %v451_v0  ;;  %419 = vmatprep.mubr.msk.bf16.mxu0 %vm69_vm0, %v453_v2  ;;  %v455_v4 = vld [vmem:[%s597_s2] sm:$0xff]   ;;  %v456_v21 = vld [vmem:[#allocation2 + $0x8] sm:$0xff]   ;;  %v573_v30 = vand.u32 127, %v313_v29  ;;  %s373_s1 = sshll.u32 %s521_s0, 4  ;;  %s374_s1 = int_to_ptr.vmem [resolvable:$true] %s373_s1 }
  0x11   :  { %417 = vmatprep.subr.bf16.mxu0 %v452_v1  ;;  %423 = vmatprep.subr.bf16.mxu1 %v455_v4  ;;  %v457_v22 = vld [vmem:[#allocation2] sm:$0xff]   ;;  %s494_s2 = scalar_lea.vmem %s374_s1, 512  ;;  %p499_p6 = scmp.lt.s32.totalorder %s374_s1, %s374_s1 }
  0x12   :  { %424 = vmatpush3.bf16.msra.mxu1 %v455_v4  ;;  %vm315_vm2 = vcmp.lt.s32.totalorder %v573_v30, 8  ;;  %p495_p5 = scmp.ne.s32.totalorder %s374_s1, %s494_s2  ;;  %p500_p7 = scmp.lt.s32.totalorder %s494_s2, %s494_s2 }
  0x14   :  { %418 = vmatpush3.bf16.msra.mxu0 %v452_v1  ;;  %p501_p8 = por %p500_p7, %p499_p6 }
  0x15   :  { %437 = vmatprep.subr.bf16.mxu0 %v456_v21 }
  0x16   :  { %p502_p9 = pnand %p501_p8, %p495_p5 }
  0x17   :  { %420 = vmatmul.mubr.msk.bf16.vlgmr.msra.gmra.mxu0 %vm69_vm0, %v454_v3 }
  0x18   :  { %438 = vmatpush3.bf16.msra.mxu0 %v456_v21 }
  0x19   :  { %439 = vmatprep.subr.bf16.mxu0 %v457_v22 }
  0x1c   :  { %440 = vmatpush3.bf16.msra.mxu0 %v457_v22 }
  0xd7   :  { %v421_v5 = vpop.f32.mrf.mxu0 }
  0xd9   :  { %v110_v6 = vpop.f32.mrf.mxu0 }
  0xdb   :  { %v422_v7 = vpop.f32.mrf.mxu0 }
  0xdc   :  { %v126_v10 = vpack.c.bf16 %v422_v7, %v421_v5 }
  0xdd   :  { %v113_v8 = vpop.f32.mrf.mxu0 }
  0xde   :  { %v125_v9 = vpack.c.bf16 %v113_v8, %v110_v6 }
  0xe0   :  { %425 = vmatprep.mubr.msk.bf16.mxu1 %vm133_vm1, %v125_v9 }
  0xe1   :  { %426 = vmatmul.mubr.msk.bf16.vlgmr.msra.gmra.mxu1 %vm133_vm1, %v126_v10 }
  0xe2   :  { %433 = vmatprep.mubr.msk.bf16.mxu1 %vm69_vm0, %v453_v2 }
 0x1a1   :  { %v427_v11 = vpop.f32.mrf.mxu1 }
 0x1a2   :  { %v191_v14 = vmax.f32 %v427_v11, 0.0 }
 0x1a3   :  { %v174_v12 = vpop.f32.mrf.mxu1 }
 0x1a4   :  { %v189_v17 = vmax.f32 %v174_v12, 0.0 }
 0x1a5   :  { %v428_v13 = vpop.f32.mrf.mxu1 }
 0x1a6   :  { %v192_v15 = vmax.f32 %v428_v13, 0.0 }
 0x1a7   :  { %v177_v16 = vpop.f32.mrf.mxu1 }
 0x1a8   :  { %v194_v18 = vpack.c.bf16 %v192_v15, %v191_v14  ;;  %v190_v19 = vmax.f32 %v177_v16, 0.0 }
 0x1aa   :  { %v193_v20 = vpack.c.bf16 %v190_v19, %v189_v17  ;;  %429 = vmatprep.subr.bf16.mxu1 %v194_v18 }
 0x1ab   :  { %430 = vmatpush3.bf16.msra.mxu1 %v194_v18 }
 0x1ac   :  { %431 = vmatprep.subr.bf16.mxu1 %v193_v20 }
 0x1af   :  { %432 = vmatpush3.bf16.msra.mxu1 %v193_v20 }
 0x1b2   :  { %434 = vmatmul.mubr.msk.bf16.vlgmr.msra.gmra.mxu1 %vm69_vm0, %v454_v3 }
 0x272   :  { %v435_v23 = vpop.f32.mrf.mxu1 }
 0x274   :  { %v229_v24 = vpop.f32.mrf.mxu1 }
 0x276   :  { %v436_v25 = vpop.f32.mrf.mxu1 }
 0x277   :  { %v245_v28 = vpack.c.bf16 %v436_v25, %v435_v23 }
 0x278   :  { %v232_v26 = vpop.f32.mrf.mxu1 }
 0x279   :  { %v244_v27 = vpack.c.bf16 %v232_v26, %v229_v24 }
 0x27b   :  { %441 = vmatprep.mubr.msk.bf16.mxu0 %vm69_vm0, %v244_v27 }
 0x27c   :  { %442 = vmatmul.mubr.msk.bf16.vlgmr.msra.gmra.mxu0 %vm69_vm0, %v245_v28 }
 0x33c   :  { %v443_v31 = vpop.f32.mrf.mxu0 }
 0x33d   :  { %v318_v32 = vsel %vm315_vm2, %v443_v31, -inf }
 0x33e   :  { %324 = vmax.xlane.f32.xlu1 %v318_v32  ;;  %v298_v33 = vpop.f32.mrf.mxu0 }
 0x33f   :  { %v316_v34 = vsel %vm315_vm2, %v298_v33, -inf }
 0x340   :  { %320 = vmax.xlane.f32.xlu0 %v316_v34  ;;  %v444_v35 = vpop.f32.mrf.mxu0 }
 0x341   :  { %v319_v36 = vsel %vm315_vm2, %v444_v35, -inf }
 0x342   :  { %326 = vmax.xlane.f32.xlu1 %v319_v36  ;;  %v301_v37 = vpop.f32.mrf.mxu0 }
 0x343   :  { %v317_v38 = vsel %vm315_vm2, %v301_v37, -inf }
 0x344   :  { %322 = vmax.xlane.f32.xlu0 %v317_v38 }
 0x3c7   :  { %v325_v39 = vpop.xlane.xlu1 %324 }
 0x3c8   :  { %v330_v40 = vsub.f32 %v318_v32, %v325_v39 }
 0x3c9   :  { %v321_v41 = vpop.xlane.xlu0 %320 }
 0x3ca   :  { %v328_v42 = vsub.f32 %v316_v34, %v321_v41  ;;  %v336_v45 = vmul.f32 1.442695, %v330_v40 }
 0x3cb   :  { %v327_v43 = vpop.xlane.xlu1 %326 }
 0x3cc   :  { %v332_v44 = vmul.f32 1.442695, %v328_v42  ;;  %v331_v47 = vsub.f32 %v319_v36, %v327_v43 }
 0x3cd   :  { %v323_v46 = vpop.xlane.xlu0 %322 }
 0x3ce   :  { %458 = vpow2.f32 %v332_v44  ;;  %v329_v48 = vsub.f32 %v317_v38, %v323_v46  ;;  %v338_v50 = vmul.f32 1.442695, %v331_v47 }
 0x3cf   :  { %460 = vpow2.f32 %v336_v45 }
 0x3d0   :  { %v334_v49 = vmul.f32 1.442695, %v329_v48 }
 0x3d2   :  { %462 = vpow2.f32 %v334_v49 }
 0x3d3   :  { %464 = vpow2.f32 %v338_v50 }
 0x3db   :  { %v459_v51 = vpop.eup %458 }
 0x3dc   :  { %340 = vadd.xlane.f32.xlu0 %v459_v51  ;;  %v461_v52 = vpop.eup %460 }
 0x3df   :  { %v463_v53 = vpop.eup %462 }
 0x3e0   :  { %344 = vadd.xlane.f32.xlu0 %v461_v52  ;;  %342 = vadd.xlane.f32.xlu1 %v463_v53  ;;  %v465_v54 = vpop.eup %464 }
 0x3e4   :  { %346 = vadd.xlane.f32.xlu1 %v465_v54 }
 0x465   :  { %v341_v55 = vpop.xlane.xlu0 %340 }
 0x466   :  { %466 = vlog2.f32 %v341_v55 }
 0x469   :  { %v343_v56 = vpop.xlane.xlu1 %342  ;;  %v345_v57 = vpop.xlane.xlu0 %344 }
 0x46a   :  { %468 = vlog2.f32 %v343_v56 }
 0x46b   :  { %470 = vlog2.f32 %v345_v57 }
 0x46d   :  { %v347_v58 = vpop.xlane.xlu1 %346 }
 0x46e   :  { %472 = vlog2.f32 %v347_v58 }
 0x473   :  { %v467_v59 = vpop.eup %466 }
 0x474   :  { %v349_v60 = vmul.f32 0.6931472, %v467_v59 }
 0x476   :  { %v356_v61 = vsub.f32 %v328_v42, %v349_v60 }
 0x477   :  { %v469_v62 = vpop.eup %468 }
 0x478   :  { %v471_v63 = vpop.eup %470  ;;  %v360_v0 = vsel %vm315_vm2, %v356_v61, 0.0  ;;  %v351_v1 = vmul.f32 0.6931472, %v469_v62 }
 0x479   :  { %364 = vst [vmem:[#allocation5] sm:$0xff] %v360_v0  ;;  %v353_v2 = vmul.f32 0.6931472, %v471_v63 }
 0x47a   :  { %v357_v3 = vsub.f32 %v329_v48, %v351_v1 }
 0x47b   :  { %v473_v4 = vpop.eup %472  ;;  %v358_v5 = vsub.f32 %v330_v40, %v353_v2 }
 0x47c   :  { %v361_v6 = vsel %vm315_vm2, %v357_v3, 0.0  ;;  %v355_v7 = vmul.f32 0.6931472, %v473_v4 }
 0x47d   :  { %365 = vst [vmem:[#allocation5 + $0x8] sm:$0xff] %v361_v6  ;;  %v362_v8 = vsel %vm315_vm2, %v358_v5, 0.0 }
 0x47e   :  { %366 = vst [vmem:[#allocation5 + $0x10] sm:$0xff] %v362_v8  ;;  %v359_v9 = vsub.f32 %v331_v47, %v355_v7 }
 0x480   :  { %v363_v10 = vsel %vm315_vm2, %v359_v9, 0.0 }
 0x481   :  { %367 = vst [vmem:[#allocation5 + $0x18] sm:$0xff] %v363_v10 }
 0x482   :  { %505 = shalt.err (!%p502_p9)
}
 0x483   :  { %s522_s5 = smov 128   ;;  %s523_s6 = smov 8  }
 0x484   :  { %379 = dma.vmem_to_hbm [thread:$0]  %s374_s1, 512, %s599_s4, [#allocation4], %s522_s5, %s522_s5, %s523_s6  }
 0x485   :  { %516 = dma.done.wait [#allocation4], 512  }
 0x486   :  { %517 = vsyncadd [#allocation4], 4294966784 }
 0x487   :  { %383 = vsyncpa [#allocation3], 1 }
 0x488   :  { %384 = vsyncpa [#allocation4], 1 }

</bundles_post_ra>
